<compile_context>
chip_gen: v5e
topology: v5e:2x2
jax: 0.10.0
libtpu: 0.0.40
codegen_flags: <defaults>
</compile_context>

<pallas_src>
import jax
import jax.numpy as jnp
import numpy as np
from jax.experimental import pallas as pl
from jax.experimental.pallas import tpu as pltpu

INV_SQRT2 = 1.0 / np.sqrt(2.0)
HAAR_L = np.array([INV_SQRT2, INV_SQRT2], dtype=np.float32)   # low-pass taps
HAAR_H = np.array([-INV_SQRT2, INV_SQRT2], dtype=np.float32)  # high-pass taps


def _stride2_operator(n, taps):
    """(n//2, n) matrix M with M[i, 2*i + p] = taps[p].
    M @ x applies a stride-2 1-D correlation with `taps` down the rows of x."""
    m = np.zeros((n // 2, n), dtype=np.float32)
    idx = np.arange(n // 2)
    m[idx, 2 * idx] = taps[0]
    m[idx, 2 * idx + 1] = taps[1]
    return m


def _pick_plane_batch(n_planes, plane_bytes):
    """Planes per grid step: ~2 MiB of input per block, unroll capped at 16,
    and >= 2 grid steps when possible (v7x megacore). Must divide n_planes."""
    target_bytes = 2 * 1024 * 1024
    cap = max(1, min(16, target_bytes // max(plane_bytes, 1)))
    cap = min(cap, n_planes)
    if n_planes >= 2:
        cap = min(cap, n_planes // 2)
    cap = max(cap, 1)
    tb = 1
    for d in range(1, cap + 1):
        if n_planes % d == 0:
            tb = d
    return tb


def wavepool_kernel(r_ref, c_ref, x_ref, y_ref):
    # r_ref: (H, H) stacked row operator [R_L; R_H]
    # c_ref: (W, W) stacked column operator [C_L | C_H]
    # x_ref: (TB, H, W) batch of input planes
    # y_ref: (TB, H, W) output slab; quadrants = [[LL, LH], [HL, HH]]
    r = r_ref[...]
    c = c_ref[...]
    tb = x_ref.shape[0]
    for b in range(tb):  # small static unroll over the plane batch
        t = jnp.dot(r, x_ref[b], preferred_element_type=jnp.float32)      # (H, W)
        y = jnp.dot(t, c, preferred_element_type=jnp.float32)             # (H, W)
        y_ref[b] = y.astype(y_ref.dtype)


@jax.jit
def wave_pool(x):
    B, C, H, W = x.shape
    assert H % 2 == 0 and W % 2 == 0
    Ho, Wo = H // 2, W // 2
    N = B * C
    dt = x.dtype

    # Stacked separable Haar operators (same coefficients the PyTorch module
    # bakes into its frozen depthwise conv filters).
    r_np = np.concatenate([_stride2_operator(H, HAAR_L),
                           _stride2_operator(H, HAAR_H)], axis=0)        # (H, H)
    c_np = np.concatenate([_stride2_operator(W, HAAR_L).T,
                           _stride2_operator(W, HAAR_H).T], axis=1)      # (W, W)
    r_mat = jnp.asarray(r_np, dtype=dt)   # cast to input dtype (perf feedback)
    c_mat = jnp.asarray(c_np, dtype=dt)

    xp = x.reshape(N, H, W)

    plane_bytes = H * W * x.dtype.itemsize
    TB = _pick_plane_batch(N, plane_bytes)
    grid = (N // TB,)

    y = pl.pallas_call(
        wavepool_kernel,
        out_shape=jax.ShapeDtypeStruct((N, H, W), dt),
        grid_spec=pltpu.PrefetchScalarGridSpec(
            num_scalar_prefetch=0,
            grid=grid,
            in_specs=[
                pl.BlockSpec((H, H), lambda n: (0, 0)),        # row operator (constant)
                pl.BlockSpec((W, W), lambda n: (0, 0)),        # column operator (constant)
                pl.BlockSpec((TB, H, W), lambda n: (n, 0, 0)), # batch of input planes
            ],
            out_specs=pl.BlockSpec((TB, H, W), lambda n: (n, 0, 0)),
        ),
        compiler_params=pltpu.CompilerParams(
            dimension_semantics=("parallel",),
            vmem_limit_bytes=32 * 1024 * 1024,
        ),
    )(r_mat, c_mat, xp)

    # Split the lane-dense slab into the four sub-bands (cheap XLA slices).
    ll = y[:, :Ho, :Wo].reshape(B, C, Ho, Wo)
    lh = y[:, :Ho, Wo:].reshape(B, C, Ho, Wo)
    hl = y[:, Ho:, :Wo].reshape(B, C, Ho, Wo)
    hh = y[:, Ho:, Wo:].reshape(B, C, Ho, Wo)
    return ll, lh, hl, hh


if __name__ == "__main__":
    key = jax.random.PRNGKey(0)
    B, C, H, W = 2, 4, 16, 16
    x = jax.random.normal(key, (B, C, H, W), dtype=jnp.float32)

    outs = wave_pool(x)
    outs = jax.block_until_ready(outs)

    # Pure-JAX reference with the exact PyTorch depthwise-Haar-conv semantics.
    a = x[:, :, 0::2, 0::2]
    b = x[:, :, 0::2, 1::2]
    c = x[:, :, 1::2, 0::2]
    d = x[:, :, 1::2, 1::2]
    ref = (0.5 * (a + b + c + d),     # LL
           0.5 * (-a + b - c + d),    # LH
           0.5 * (-a - b + c + d),    # HL
           0.5 * (a - b - c + d))     # HH

    for o, rr in zip(outs, ref):
        assert o.shape == (B, C, H // 2, W // 2) and o.dtype == x.dtype
        np.testing.assert_allclose(np.asarray(o), np.asarray(rr), atol=1e-4, rtol=1e-4)

    print("KERNEL_OK")
</pallas_src>

<mosaic_0001>
module attributes {stable_mosaic.version = 11 : i64} {
  func.func @wavepool_kernel(%arg0: i32, %arg1: memref<16x16xf32, #tpu.memory_space<vmem>>, %arg2: memref<16x16xf32, #tpu.memory_space<vmem>>, %arg3: memref<4x16x16xf32, #tpu.memory_space<vmem>>, %arg4: memref<4x16x16xf32, #tpu.memory_space<vmem>>) attributes {dimension_semantics = [#tpu.dimension_semantics<parallel>], iteration_bounds = array<i64: 2>, scalar_prefetch = 0 : i64, scratch_operands = 0 : i64, tpu.core_type = #tpu.core_type<tc>, window_params = [{pipeline_mode = #tpu.pipeline_mode<synchronous>, transform_indices = @transform_0, window_bounds = array<i64: 16, 16>}, {pipeline_mode = #tpu.pipeline_mode<synchronous>, transform_indices = @transform_1, window_bounds = array<i64: 16, 16>}, {transform_indices = @transform_2, window_bounds = array<i64: 4, 16, 16>}, {transform_indices = @transform_3, window_bounds = array<i64: 4, 16, 16>}]} {
    %c0 = arith.constant 0 : index
    %c0_0 = arith.constant 0 : index
    %0 = vector.load %arg1[%c0, %c0_0] : memref<16x16xf32, #tpu.memory_space<vmem>>, vector<16x16xf32>
    %c0_1 = arith.constant 0 : index
    %c0_2 = arith.constant 0 : index
    %1 = vector.load %arg2[%c0_1, %c0_2] : memref<16x16xf32, #tpu.memory_space<vmem>>, vector<16x16xf32>
    %c0_3 = arith.constant 0 : index
    %c0_4 = arith.constant 0 : index
    %c0_5 = arith.constant 0 : index
    %2 = vector.load %arg3[%c0_3, %c0_4, %c0_5] : memref<4x16x16xf32, #tpu.memory_space<vmem>>, vector<1x16x16xf32>
    %3 = vector.shape_cast %2 : vector<1x16x16xf32> to vector<16x16xf32>
    %cst = arith.constant dense<0.000000e+00> : vector<16x16xf32>
    %4 = tpu.matmul %0, %3, %cst {dimension_numbers = #tpu.dot_dimension_numbers<[1], [0], [0], [1], [0, 0, 1, 1], [], []>} : vector<16x16xf32>, vector<16x16xf32>, vector<16x16xf32> -> vector<16x16xf32>
    %cst_6 = arith.constant dense<0.000000e+00> : vector<16x16xf32>
    %5 = tpu.matmul %4, %1, %cst_6 {dimension_numbers = #tpu.dot_dimension_numbers<[1], [0], [0], [1], [0, 0, 1, 1], [], []>} : vector<16x16xf32>, vector<16x16xf32>, vector<16x16xf32> -> vector<16x16xf32>
    %c0_7 = arith.constant 0 : index
    %c0_8 = arith.constant 0 : index
    %c0_9 = arith.constant 0 : index
    %6 = vector.load %arg4[%c0_7, %c0_8, %c0_9] : memref<4x16x16xf32, #tpu.memory_space<vmem>>, vector<1x16x16xf32>
    %7 = vector.shape_cast %6 : vector<1x16x16xf32> to vector<16x16xf32>
    %8 = vector.shape_cast %5 : vector<16x16xf32> to vector<1x16x16xf32>
    tpu.vector_store %arg4[%c0_7, %c0_8, %c0_9], %8 {strides = array<i32>} : memref<4x16x16xf32, #tpu.memory_space<vmem>>, vector<1x16x16xf32>,
    %c1 = arith.constant 1 : index
    %c0_10 = arith.constant 0 : index
    %c0_11 = arith.constant 0 : index
    %9 = vector.load %arg3[%c1, %c0_10, %c0_11] : memref<4x16x16xf32, #tpu.memory_space<vmem>>, vector<1x16x16xf32>
    %10 = vector.shape_cast %9 : vector<1x16x16xf32> to vector<16x16xf32>
    %cst_12 = arith.constant dense<0.000000e+00> : vector<16x16xf32>
    %11 = tpu.matmul %0, %10, %cst_12 {dimension_numbers = #tpu.dot_dimension_numbers<[1], [0], [0], [1], [0, 0, 1, 1], [], []>} : vector<16x16xf32>, vector<16x16xf32>, vector<16x16xf32> -> vector<16x16xf32>
    %cst_13 = arith.constant dense<0.000000e+00> : vector<16x16xf32>
    %12 = tpu.matmul %11, %1, %cst_13 {dimension_numbers = #tpu.dot_dimension_numbers<[1], [0], [0], [1], [0, 0, 1, 1], [], []>} : vector<16x16xf32>, vector<16x16xf32>, vector<16x16xf32> -> vector<16x16xf32>
    %c1_14 = arith.constant 1 : index
    %c0_15 = arith.constant 0 : index
    %c0_16 = arith.constant 0 : index
    %13 = vector.load %arg4[%c1_14, %c0_15, %c0_16] : memref<4x16x16xf32, #tpu.memory_space<vmem>>, vector<1x16x16xf32>
    %14 = vector.shape_cast %13 : vector<1x16x16xf32> to vector<16x16xf32>
    %15 = vector.shape_cast %12 : vector<16x16xf32> to vector<1x16x16xf32>
    tpu.vector_store %arg4[%c1_14, %c0_15, %c0_16], %15 {strides = array<i32>} : memref<4x16x16xf32, #tpu.memory_space<vmem>>, vector<1x16x16xf32>,
    %c2 = arith.constant 2 : index
    %c0_17 = arith.constant 0 : index
    %c0_18 = arith.constant 0 : index
    %16 = vector.load %arg3[%c2, %c0_17, %c0_18] : memref<4x16x16xf32, #tpu.memory_space<vmem>>, vector<1x16x16xf32>
    %17 = vector.shape_cast %16 : vector<1x16x16xf32> to vector<16x16xf32>
    %cst_19 = arith.constant dense<0.000000e+00> : vector<16x16xf32>
    %18 = tpu.matmul %0, %17, %cst_19 {dimension_numbers = #tpu.dot_dimension_numbers<[1], [0], [0], [1], [0, 0, 1, 1], [], []>} : vector<16x16xf32>, vector<16x16xf32>, vector<16x16xf32> -> vector<16x16xf32>
    %cst_20 = arith.constant dense<0.000000e+00> : vector<16x16xf32>
    %19 = tpu.matmul %18, %1, %cst_20 {dimension_numbers = #tpu.dot_dimension_numbers<[1], [0], [0], [1], [0, 0, 1, 1], [], []>} : vector<16x16xf32>, vector<16x16xf32>, vector<16x16xf32> -> vector<16x16xf32>
    %c2_21 = arith.constant 2 : index
    %c0_22 = arith.constant 0 : index
    %c0_23 = arith.constant 0 : index
    %20 = vector.load %arg4[%c2_21, %c0_22, %c0_23] : memref<4x16x16xf32, #tpu.memory_space<vmem>>, vector<1x16x16xf32>
    %21 = vector.shape_cast %20 : vector<1x16x16xf32> to vector<16x16xf32>
    %22 = vector.shape_cast %19 : vector<16x16xf32> to vector<1x16x16xf32>
    tpu.vector_store %arg4[%c2_21, %c0_22, %c0_23], %22 {strides = array<i32>} : memref<4x16x16xf32, #tpu.memory_space<vmem>>, vector<1x16x16xf32>,
    %c3 = arith.constant 3 : index
    %c0_24 = arith.constant 0 : index
    %c0_25 = arith.constant 0 : index
    %23 = vector.load %arg3[%c3, %c0_24, %c0_25] : memref<4x16x16xf32, #tpu.memory_space<vmem>>, vector<1x16x16xf32>
    %24 = vector.shape_cast %23 : vector<1x16x16xf32> to vector<16x16xf32>
    %cst_26 = arith.constant dense<0.000000e+00> : vector<16x16xf32>
    %25 = tpu.matmul %0, %24, %cst_26 {dimension_numbers = #tpu.dot_dimension_numbers<[1], [0], [0], [1], [0, 0, 1, 1], [], []>} : vector<16x16xf32>, vector<16x16xf32>, vector<16x16xf32> -> vector<16x16xf32>
    %cst_27 = arith.constant dense<0.000000e+00> : vector<16x16xf32>
    %26 = tpu.matmul %25, %1, %cst_27 {dimension_numbers = #tpu.dot_dimension_numbers<[1], [0], [0], [1], [0, 0, 1, 1], [], []>} : vector<16x16xf32>, vector<16x16xf32>, vector<16x16xf32> -> vector<16x16xf32>
    %c3_28 = arith.constant 3 : index
    %c0_29 = arith.constant 0 : index
    %c0_30 = arith.constant 0 : index
    %27 = vector.load %arg4[%c3_28, %c0_29, %c0_30] : memref<4x16x16xf32, #tpu.memory_space<vmem>>, vector<1x16x16xf32>
    %28 = vector.shape_cast %27 : vector<1x16x16xf32> to vector<16x16xf32>
    %29 = vector.shape_cast %26 : vector<16x16xf32> to vector<1x16x16xf32>
    tpu.vector_store %arg4[%c3_28, %c0_29, %c0_30], %29 {strides = array<i32>} : memref<4x16x16xf32, #tpu.memory_space<vmem>>, vector<1x16x16xf32>,
    return
  }
  func.func @transform_0(%arg0: i32) -> (i32, i32) {
    %c0_i32 = arith.constant 0 : i32
    %c0_i32_0 = arith.constant 0 : i32
    %c0_i32_1 = arith.constant 0 : i32
    return %c0_i32, %c0_i32_0 : i32, i32
  }
  func.func @transform_1(%arg0: i32) -> (i32, i32) {
    %c0_i32 = arith.constant 0 : i32
    %c0_i32_0 = arith.constant 0 : i32
    %c0_i32_1 = arith.constant 0 : i32
    return %c0_i32, %c0_i32_0 : i32, i32
  }
  func.func @transform_2(%arg0: i32) -> (i32, i32, i32) {
    %c0_i32 = arith.constant 0 : i32
    %c0_i32_0 = arith.constant 0 : i32
    %c0_i32_1 = arith.constant 0 : i32
    return %arg0, %c0_i32, %c0_i32_0 : i32, i32, i32
  }
  func.func @transform_3(%arg0: i32) -> (i32, i32, i32) {
    %c0_i32 = arith.constant 0 : i32
    %c0_i32_0 = arith.constant 0 : i32
    %c0_i32_1 = arith.constant 0 : i32
    return %arg0, %c0_i32, %c0_i32_0 : i32, i32, i32
  }
}

</mosaic_0001>

<bundles_post_ra>
// kernel: wave_pool.1
= control target key start
LH: loop header
LB: loop body
LE: loop exit
PB: predicated region body
PF: predicated region fallthrough
CT: control target
= control target key end

     0   :  { %8 = vsyncpa [#allocation3], 0  ;;  %s974_s0 = inlined_call_operand.hbm [shape: f32[16,16], index: 0, kind: input, shape index: {}]   ;;  %s975_s1 = inlined_call_operand.hbm [shape: f32[16,16], index: 1, kind: input, shape index: {}]   ;;  %s976_s2 = inlined_call_operand.hbm [shape: f32[8,16,16], index: 2, kind: input, shape index: {}]   ;;  %s977_s3 = inlined_call_operand.vmem [shape: f32[8,16,16], index: 3, kind: output, shape index: {}]  }
   0x1   :  { %9 = vsyncpa [#allocation5], 0  ;;  %s828_s12 = smov 0   ;;  %s830_s13 = smov 0  }
   0x2   :  { %s832_s14 = smov 0   ;;  %s834_s15 = smov 0  }
   0x3 LB: > { %s847_s16 = sadd.s32 4294967295, %s802_s15   ;;  %p77_p0 = scmp.ne.s32.totalorder %s794_s13, %s790_s12  ;;  %s802_s15 = sphi %s834_s15, %s984_s15   ;;  %s798_s14 = sphi %s832_s14, %s983_s14   ;;  %s794_s13 = sphi %s830_s13, %s982_s13   ;;  %s790_s12 = sphi %s828_s12, %s981_s12  }
   0x4   : > { %p78_p1 = scmp.eq.s32.totalorder %s847_s16, 0  ;;  %p560_p2 = scmp.ge.s32.totalorder %s802_s15, 1 }
   0x5   : > { %p114_p3 = scmp.lt.s32.totalorder %s802_s15, 3  ;;  %s125_s20 = sshll.u32 %s974_s0, 4  ;;  %s126_s20 = int_to_ptr.hbm [resolvable:$true] %s125_s20 }
   0x6   : > { %p855_p4 = por %p78_p1, %p77_p0  ;;  %s804_s22 = smov [#allocation2]  }
   0x7   : > { %p862_p5 = pnand %p560_p2, %p114_p3  ;;  %s127_s23 = sshll.u32 %s804_s22, 4  ;;  %s128_s23 = int_to_ptr.vmem [resolvable:$true] %s127_s23 }
   0x8   : > { %s139_s26 = sshll.u32 %s975_s1, 4  ;;  %s805_s27 = smov 128   ;;  %s140_s26 = int_to_ptr.hbm [resolvable:$true] %s139_s26 }
   0x9   : > { %p618_p6 = pneg %p862_p5  ;;  %s806_s28 = smov 8  }
   0xa   : > { %s807_s29 = smov [#allocation4]   ;;  %s880_s4 = sadd.s32 1, %s802_s15  }
   0xb   : > { %p619_p7 = pnand %p618_p6, %p78_p1  ;;  %s141_s30 = sshll.u32 %s807_s29, 4  ;;  %s142_s30 = int_to_ptr.vmem [resolvable:$true] %s141_s30 }
   0xc   : > { %s64_s5 = sadd.s32 1, %s798_s14  ;;  %s61_s6 = ssub.s32 %s802_s15, %s880_s4 }
   0xd   : > { %621 = dma.hbm_to_vmem [thread:$0]  (!%p619_p7), %s126_s20, 256, %s128_s23, [#allocation3], %s805_s27, %s805_s27, %s806_s28  }
   0xe   : > { %624 = dma.hbm_to_vmem [thread:$0]  (!%p619_p7), %s140_s26, 256, %s142_s30, [#allocation5], %s805_s27, %s805_s27, %s806_s28  }
   0xf   : > { %p71_p8 = scmp.ne.s32.totalorder %s798_s14, %s794_s13  ;;  %p62_p9 = scmp.eq.s32.totalorder %s61_s6, 0 }
  0x10   : > { %p72_p10 = scmp.eq.s32.totalorder %s802_s15, 0  ;;  %p631_p11 = scmp.lt.s32.totalorder %s802_s15, 2 }
  0x11   : > { %s155_s7 = sand.u32 1, %s802_s15   ;;  %s157_s9 = sand.u32 1, %s798_s14  }
  0x12   : > { %s891_s8 = scalar_select %p62_p9, %s798_s14, %s64_s5  }
  0x13   : > { %p73_p12 = por %p72_p10, %p71_p8  ;;  %s606_s10 = sshll.u32 %s802_s15, 6 }
  0x14   : > { %s564_s11 = sshll.u32 %s157_s9, 6  ;;  %s165_s19 = scalar_lea.hbm %s976_s2, %s606_s10 }
  0x15   : > { %s166_s20 = sshll.u32 %s165_s19, 4  ;;  %s159_s22 = scalar_lea.vmem [#allocation6], %s564_s11  ;;  %s167_s20 = int_to_ptr.hbm [resolvable:$true] %s166_s20 }
  0x16   : > { %s168_s23 = sshll.u32 %s159_s22, 4  ;;  %p900_p13 = pnand %p631_p11, %p73_p12  ;;  %s169_s23 = int_to_ptr.vmem [resolvable:$true] %s168_s23 }
  0x17   : > { %s156_s25 = scalar_lea.sflag [#allocation3], %s155_s7  ;;  %s730_s26 = sshra.s32 %s167_s20, 4  ;;  %s731_s26 = int_to_ptr.hbm [resolvable:$true] %s730_s26 }
  0x18   : > { %s732_s29 = scalar_lea.hbm %s731_s26, 64  ;;  %p734_p2 = pneg %p900_p13 }
  0x19   : > { %p733_p0 = scmp.ne.s32.totalorder %s731_s26, %s732_s29  ;;  %s737_s6 = scalar_lea.hbm %s976_s2, 128 }
  0x1a   : > { %p738_p7 = scmp.lt.s32.totalorder %s731_s26, %s976_s2  ;;  %p739_p8 = scmp.lt.s32.totalorder %s737_s6, %s732_s29 }
  0x1b   : > { %p735_p3 = pnand %p734_p2, %p733_p0 }
  0x1c   : > { %p740_p9 = por %p739_p8, %p738_p7 }
  0x1d   : > { %p736_p6 = pneg %p735_p3 }
  0x1f   : > { %p741_p10 = pnand %p740_p9, %p736_p6 }
  0x21   : > { %744 = shalt.err (!%p741_p10)
}
  0x22   : > { %628 = dma.hbm_to_vmem [thread:$0]  (!%p900_p13), %s167_s20, 1024, %s169_s23, %s156_s25, %s805_s27, %s805_s27, %s806_s28  }
  0x23   : > { %180 = sbr.rel (%p862_p5) target bundleno = 340 (0x154), region = 32 }
  0x28   : > { %777 = dma.done.wait (%p78_p1), [#allocation3], 256  }
  0x29   : > { %779 = vsyncadd (%p78_p1), [#allocation3], 4294967040 }
  0x2a   : > { %781 = dma.done.wait (%p78_p1), [#allocation5], 256  }
  0x2b   : > { %783 = vsyncadd (%p78_p1), [#allocation5], 4294967040  ;;  %s192_s7 = sand.u32 1, %s847_s16   ;;  %s194_s27 = sand.u32 1, %s794_s13  }
  0x2c   : > { %s571_s28 = sshll.u32 %s194_s27, 6  ;;  %s193_s21 = scalar_lea.sflag [#allocation3], %s192_s7 }
  0x2d   : > { %s196_s10 = scalar_lea.vmem [#allocation6], %s571_s28 }
  0x2e   : > { %785 = dma.done.wait (%p855_p4), %s193_s21, 1024  }
  0x2f   : > { %787 = vsyncadd (%p855_p4), %s193_s21, 4294966272  ;;  %v580_v0 = vld [vmem:[%s196_s10 + $0x18] sm:$0xff]  ;;  %v579_v1 = vld [vmem:[%s196_s10 + $0x10] sm:$0xff]  ;;  %vm235_vm0 = vcmask 130048   ;;  %s572_s17 = sshll.u32 %s847_s16, 2 }
  0x30   : > { %313 = vmatpush.msra.mxu2 %v580_v0  ;;  %v229_v2 = vld [vmem:[#allocation2] sm:$0xff]  ;;  %v234_v3 = vld [vmem:[%s196_s10 + $0x8] sm:$0xff]  ;;  %v596_v4 = vld [vmem:[%s196_s10 + $0x38] sm:$0xff]  ;;  %p223_p1 = scmp.lt.s32.totalorder %s572_s17, 7 }
  0x31   : > { %256 = vmatpush.msra.mxu0 %v234_v3  ;;  %v233_v5 = vld [vmem:[%s196_s10] sm:$0xff]  ;;  %v588_v6 = vld [vmem:[%s196_s10 + $0x28] sm:$0xff]  ;;  %v232_v7 = vld [vmem:[#allocation4 + $0x8] sm:$0xff] }
  0x32   : > { %314 = vmatpush.msra.mxu2 %v579_v1  ;;  %v595_v8 = vld [vmem:[%s196_s10 + $0x30] sm:$0xff]  ;;  %v587_v9 = vld [vmem:[%s196_s10 + $0x20] sm:$0xff]  ;;  %342 = vmatpush.msra.mxu3 %v232_v7  ;;  %v230_v10 = vld [vmem:[#allocation2 + $0x8] sm:$0xff]  ;;  %s986_s17 = smov (!%p223_p1, %s572_s17), 7 }
  0x33   : > { %581 = vmatmul.msk.f32.vlgmr.msra.gmra.mxu2 %vm235_vm0, %v229_v2  ;;  %257 = vmatpush.msra.mxu0 %v233_v5  ;;  %v231_v11 = vld [vmem:[#allocation4] sm:$0xff]  ;;  %s607_s11 = sshll.u32 %s986_s17, 4 }
  0x34   : > { %429 = vmatpush.msrb.mxu2 %v596_v4  ;;  %575 = vmatmul.msk.f32.vlgmr.msra.gmra.mxu0 %vm235_vm0, %v229_v2  ;;  %s227_s19 = scalar_lea.vmem %s977_s3, %s607_s11 }
  0x35   : > { %371 = vmatpush.msrb.mxu0 %v588_v6  ;;  %285 = vmatpush.msra.mxu1 %v232_v7 }
  0x36   : > { %430 = vmatpush.msrb.mxu2 %v595_v8  ;;  %343 = vmatpush.msra.mxu3 %v231_v11 }
  0x37   : > { %372 = vmatpush.msrb.mxu0 %v587_v9  ;;  %286 = vmatpush.msra.mxu1 %v231_v11 }
  0x38   : > { %458 = vmatpush.msrb.mxu3 %v232_v7 }
  0x39   : > { %400 = vmatpush.msrb.mxu1 %v232_v7 }
  0x3a   : > { %459 = vmatpush.msrb.mxu3 %v231_v11 }
  0x3b   : > { %582 = vmatmul.msk.f32.gmra.mxu2 %vm235_vm0, %v230_v10  ;;  %401 = vmatpush.msrb.mxu1 %v231_v11 }
  0x3c   : > { %576 = vmatmul.msk.f32.gmra.mxu0 %vm235_vm0, %v230_v10 }
  0x43   : > { %597 = vmatmul.msk.f32.vlgmr.msrb.gmra.mxu2 %vm235_vm0, %v229_v2 }
  0x44   : > { %589 = vmatmul.msk.f32.vlgmr.msrb.gmra.mxu0 %vm235_vm0, %v229_v2 }
  0x4b   : > { %598 = vmatmul.msk.f32.gmra.mxu2 %vm235_vm0, %v230_v10 }
  0x4c   : > { %590 = vmatmul.msk.f32.gmra.mxu0 %vm235_vm0, %v230_v10 }
  0xb1   : > { %v259_v12 = vpop.f32.mrf.mxu0 }
  0xb2   : > { %577 = vmatmul.msk.f32.vlgmr.msra.gmra.mxu1 %vm235_vm0, %v259_v12 }
  0xb6   : > { %v316_v13 = vpop.f32.mrf.mxu2 }
  0xb7   : > { %583 = vmatmul.msk.f32.vlgmr.msra.gmra.mxu3 %vm235_vm0, %v316_v13 }
  0xb9   : > { %v262_v14 = vpop.f32.mrf.mxu0 }
  0xba   : > { %578 = vmatmul.msk.f32.gmra.mxu1 %vm235_vm0, %v262_v14 }
  0xbe   : > { %v319_v15 = vpop.f32.mrf.mxu2 }
  0xbf   : > { %584 = vmatmul.msk.f32.gmra.mxu3 %vm235_vm0, %v319_v15 }
  0xc1   : > { %v374_v16 = vpop.f32.mrf.mxu0 }
  0xc2   : > { %591 = vmatmul.msk.f32.vlgmr.msrb.gmra.mxu1 %vm235_vm0, %v374_v16 }
  0xc6   : > { %v432_v17 = vpop.f32.mrf.mxu2 }
  0xc7   : > { %599 = vmatmul.msk.f32.vlgmr.msrb.gmra.mxu3 %vm235_vm0, %v432_v17 }
  0xc9   : > { %v377_v18 = vpop.f32.mrf.mxu0 }
  0xca   : > { %592 = vmatmul.msk.f32.gmra.mxu1 %vm235_vm0, %v377_v18 }
  0xce   : > { %v435_v19 = vpop.f32.mrf.mxu2 }
  0xcf   : > { %600 = vmatmul.msk.f32.gmra.mxu3 %vm235_vm0, %v435_v19 }
 0x12f   : > { %v288_v20 = vpop.f32.mrf.mxu1 }
 0x130   : > { %294 = vst.msk [vmem:[%s227_s19] sm:$0xff] %vm235_vm0, %v288_v20 }
 0x137   : > { %v291_v21 = vpop.f32.mrf.mxu1 }
 0x138   : > { %295 = vst.msk [vmem:[%s227_s19 + $0x8] sm:$0xff] %vm235_vm0, %v291_v21 }
 0x13a   : > { %v345_v22 = vpop.f32.mrf.mxu3 }
 0x13b   : > { %585 = vst.msk [vmem:[%s227_s19 + $0x10] sm:$0xff] %vm235_vm0, %v345_v22 }
 0x13f   : > { %v403_v23 = vpop.f32.mrf.mxu1 }
 0x140   : > { %593 = vst.msk [vmem:[%s227_s19 + $0x20] sm:$0xff] %vm235_vm0, %v403_v23 }
 0x142   : > { %v348_v24 = vpop.f32.mrf.mxu3 }
 0x143   : > { %586 = vst.msk [vmem:[%s227_s19 + $0x18] sm:$0xff] %vm235_vm0, %v348_v24 }
 0x147   : > { %v406_v25 = vpop.f32.mrf.mxu1 }
 0x148   : > { %594 = vst.msk [vmem:[%s227_s19 + $0x28] sm:$0xff] %vm235_vm0, %v406_v25 }
 0x14a   : > { %v461_v26 = vpop.f32.mrf.mxu3 }
 0x14b   : > { %601 = vst.msk [vmem:[%s227_s19 + $0x30] sm:$0xff] %vm235_vm0, %v461_v26 }
 0x152   : > { %v464_v27 = vpop.f32.mrf.mxu3 }
 0x153   : > { %602 = vst.msk [vmem:[%s227_s19 + $0x38] sm:$0xff] %vm235_vm0, %v464_v27 }
 0x154 PF: > { %p12_p4 = scmp.ge.s32.totalorder %s880_s4, 4   ;;  %s981_s12 = smov %s794_s13 }
 0x155   : > { %s982_s13 = smov %s798_s14  ;;  %s983_s14 = smov %s891_s8 }
 0x156   : > { %s984_s15 = smov %s880_s4  ;;  %14 = sbr.rel (!%p12_p4) target bundleno = 3 (0x3), region = 85 }
 0x15b   :  { %494 = vsyncpa [#allocation3], 1 }
 0x15c   :  { %496 = vsyncpa [#allocation3 + $0x1], 1 }
 0x15d   :  { %497 = vsyncpa [#allocation5], 1 }

</bundles_post_ra>
